<compile_context>
chip_gen: v7x
topology: tpu7x:2x2x1
jax: 0.10.0
libtpu: 0.0.40
codegen_flags: <defaults>
</compile_context>

<pallas_src>
import functools

import jax
import jax.numpy as jnp
from jax.experimental import pallas as pl
from jax.experimental.pallas import tpu as pltpu

EPS = 1e-5          # nn.LayerNorm default eps
NEG_SLOPE = 0.01    # F.leaky_relu default negative_slope


def _make_kernel(T, tile, c_in, c_out, mxu_dtype):
    """Builds the fused LN + leaky_relu + strided-conv kernel for one (b, t) tile."""

    def kernel(xe_ref, xo_ref, pn_ref, g_ref, b_ref, w_ref, o_ref):
        # xe_ref/xo_ref: (1, tile, c_in)  even / odd time rows of this tile
        # pn_ref:        (1, 1, 2, c_in)  [prev halo row, next halo row] (raw x rows)
        # g_ref/b_ref:   (1, c_in)        LayerNorm affine
        # w_ref:         (4*c_in, c_out)  conv taps stacked [W0; W1; W2; W3]
        # o_ref:         (1, tile, c_out)
        t = pl.program_id(1)
        q0 = t * tile                                  # first output row of this tile

        gamma = g_ref[...]                             # (1, c_in) -- loaded once
        beta = b_ref[...]

        def ln_act(v):                                 # LayerNorm over channels + leaky_relu
            mean = jnp.mean(v, axis=-1, keepdims=True)
            cen = v - mean
            var = jnp.mean(cen * cen, axis=-1, keepdims=True)
            z = cen * jax.lax.rsqrt(var + EPS)
            z = z * gamma + beta
            return jnp.where(z >= 0, z, NEG_SLOPE * z)

        q = q0 + jax.lax.broadcasted_iota(jnp.int32, (tile, 1), 0)   # output-row index

        ze = ln_act(xe_ref[0])                         # z[2q]   (tile, c_in)
        zo = ln_act(xo_ref[0])                         # z[2q+1]
        # rows outside the true sequence act as the conv's zero padding
        ze = jnp.where(2 * q < T, ze, 0.0)
        zo = jnp.where(2 * q + 1 < T, zo, 0.0)

        # halo rows (raw x), normalized+activated here, masked to zero when they fall
        # outside [0, T) (i.e. they are the conv's zero padding).
        halo = ln_act(pn_ref[0, 0])                    # (2, c_in)
        pmask = (q0 > 0).astype(ze.dtype)              # z[2*q0 - 1] exists iff q0 >= 1
        nmask = (2 * (q0 + tile) < T).astype(ze.dtype)
        prev_row = halo[0:1, :] * pmask                # z[2*q0 - 1]
        next_row = halo[1:2, :] * nmask                # z[2*(q0 + tile)]

        # shifted tap views via XLU roll + 1-row boundary fix (no unaligned concat)
        row = jax.lax.broadcasted_iota(jnp.int32, (tile, 1), 0)
        zo_dn = pltpu.roll(zo, shift=1, axis=0)        # z[2r-1]
        zo_dn = jnp.where(row == 0, prev_row, zo_dn)
        ze_up = pltpu.roll(ze, shift=tile - 1, axis=0) # z[2r+2]  (roll up by one)
        ze_up = jnp.where(row == tile - 1, next_row, ze_up)

        # single fused MXU matmul with contraction depth 4*c_in
        zcat = jnp.concatenate([zo_dn, ze, zo, ze_up], axis=-1)     # (tile, 4*c_in)
        w = w_ref[...]
        if mxu_dtype is not None:
            zcat = zcat.astype(mxu_dtype)
            w = w.astype(mxu_dtype)
        y = jnp.dot(zcat, w, preferred_element_type=jnp.float32)
        o_ref[0] = y.astype(o_ref.dtype)

    return kernel


def downsample_block(x_bct, gamma, beta, conv_weight, *, tile=512, mxu_dtype=None):
    """PyTorch-layout entry point.

    x_bct:       (B, C_in, T)      -- nn.Conv1d input layout
    gamma, beta: (C_in,)           -- nn.LayerNorm affine params
    conv_weight: (C_out, C_in, 4)  -- nn.Conv1d weight (k=4, stride=2, pad=1, no bias)
    returns:     (B, C_out, T // 2)
    """
    B, C_in, T = x_bct.shape
    C_out = conv_weight.shape[0]
    assert conv_weight.shape == (C_out, C_in, 4)
    dtype = x_bct.dtype

    T_out = (T + 2 * 1 - 4) // 2 + 1                   # == T // 2 for T >= 2
    n_pairs = (T + 1) // 2                             # number of (even, odd) row pairs

    # output-rows per grid step: multiple of 8 sublanes, capped by the sequence
    tile = max(8, -(-min(tile, n_pairs) // 8) * 8)
    nT = -(-n_pairs // tile)
    n_pairs_pad = nT * tile
    T_pad = 2 * n_pairs_pad
    BLK = 2 * tile                                     # input rows consumed per tile

    # wrapper-side layout plumbing (XLA): channels-last, pad T, de-interleave even/odd
    x_btc = jnp.transpose(x_bct, (0, 2, 1))            # (B, T, C_in)
    x_pad = jnp.pad(x_btc, ((0, 0), (0, T_pad - T), (0, 0)))
    xe = x_pad[:, 0::2, :]                             # (B, n_pairs_pad, C_in)  rows z[2q]
    xo = x_pad[:, 1::2, :]                             #                         rows z[2q+1]

    # per-tile halo rows: prev[t] = x[2*t*tile - 1], next[t] = x[2*(t+1)*tile]
    zrow = jnp.zeros((B, 1, C_in), dtype)
    prev = jnp.concatenate([zrow, x_pad[:, BLK - 1::BLK, :][:, :nT - 1, :]], axis=1)
    nxt = jnp.concatenate([x_pad[:, BLK::BLK, :], zrow], axis=1)
    pn = jnp.stack([prev, nxt], axis=2)                # (B, nT, 2, C_in)

    # conv taps stacked for one K=4*C_in matmul: rows [W0; W1; W2; W3], Wk = (C_in, C_out)
    w_all = jnp.transpose(conv_weight, (2, 1, 0)).reshape(4 * C_in, C_out).astype(dtype)
    gamma2 = jnp.asarray(gamma, dtype).reshape(1, C_in)
    beta2 = jnp.asarray(beta, dtype).reshape(1, C_in)

    kernel = _make_kernel(T=T, tile=tile, c_in=C_in, c_out=C_out, mxu_dtype=mxu_dtype)

    out = pl.pallas_call(
        kernel,
        out_shape=jax.ShapeDtypeStruct((B, n_pairs_pad, C_out), dtype),
        grid=(B, nT),
        in_specs=[
            pl.BlockSpec((1, tile, C_in), lambda b, t: (b, t, 0)),      # xe
            pl.BlockSpec((1, tile, C_in), lambda b, t: (b, t, 0)),      # xo
            pl.BlockSpec((1, 1, 2, C_in), lambda b, t: (b, t, 0, 0)),   # halo rows
            pl.BlockSpec((1, C_in), lambda b, t: (0, 0)),               # gamma (block-invariant)
            pl.BlockSpec((1, C_in), lambda b, t: (0, 0)),               # beta
            pl.BlockSpec((4 * C_in, C_out), lambda b, t: (0, 0)),       # conv weights
        ],
        out_specs=pl.BlockSpec((1, tile, C_out), lambda b, t: (b, t, 0)),
        compiler_params=pltpu.CompilerParams(
            dimension_semantics=("parallel", "parallel"),
            vmem_limit_bytes=64 * 1024 * 1024,
        ),
    )(xe, xo, pn, gamma2, beta2, w_all)

    y = out[:, :T_out, :]                              # drop padded output rows
    return jnp.transpose(y, (0, 2, 1))                 # (B, C_out, T_out)


def _reference(x_bct, gamma, beta, conv_weight):
    """Pure-JAX reference with PyTorch semantics."""
    x = jnp.transpose(x_bct, (0, 2, 1))                # (B, T, C_in)
    mean = jnp.mean(x, axis=-1, keepdims=True)
    var = jnp.mean((x - mean) ** 2, axis=-1, keepdims=True)
    z = (x - mean) / jnp.sqrt(var + EPS) * gamma + beta
    z = jnp.where(z >= 0, z, NEG_SLOPE * z)
    z_bct = jnp.transpose(z, (0, 2, 1))                # (B, C_in, T)
    return jax.lax.conv_general_dilated(
        z_bct, conv_weight, window_strides=(2,), padding=((1, 1),),
        dimension_numbers=("NCH", "OIH", "NCH"),
        precision=jax.lax.Precision.HIGHEST)


if __name__ == "__main__":
    B, C_in, C_out, T = 2, 4, 8, 16
    key = jax.random.PRNGKey(0)
    kx, kw, kg, kb = jax.random.split(key, 4)

    x = jax.random.normal(kx, (B, C_in, T), dtype=jnp.float32)          # (B, C_in, T)
    gamma = 1.0 + 0.1 * jax.random.normal(kg, (C_in,), dtype=jnp.float32)
    beta = 0.1 * jax.random.normal(kb, (C_in,), dtype=jnp.float32)
    conv_weight = 0.1 * jax.random.normal(kw, (C_out, C_in, 4), dtype=jnp.float32)

    out = downsample_block(x, gamma, beta, conv_weight)
    out = jax.block_until_ready(out)

    ref = _reference(x, gamma, beta, conv_weight)
    assert out.shape == (B, C_out, T // 2)
    max_err = float(jnp.max(jnp.abs(out - ref)))
    assert jnp.allclose(out, ref, atol=1e-2, rtol=1e-2), max_err

    print("KERNEL_OK")
</pallas_src>

<mosaic_0001>
module attributes {stable_mosaic.version = 11 : i64} {
  func.func @kernel(%arg0: i32, %arg1: i32, %arg2: memref<1x8x4xf32, #tpu.memory_space<vmem>>, %arg3: memref<1x8x4xf32, #tpu.memory_space<vmem>>, %arg4: memref<1x1x2x4xf32, #tpu.memory_space<vmem>>, %arg5: memref<1x4xf32, #tpu.memory_space<vmem>>, %arg6: memref<1x4xf32, #tpu.memory_space<vmem>>, %arg7: memref<16x8xf32, #tpu.memory_space<vmem>>, %arg8: memref<1x8x8xf32, #tpu.memory_space<vmem>>) attributes {dimension_semantics = [#tpu.dimension_semantics<parallel>, #tpu.dimension_semantics<parallel>], iteration_bounds = array<i64: 2, 1>, scalar_prefetch = 0 : i64, scratch_operands = 0 : i64, tpu.core_type = #tpu.core_type<tc>, window_params = [{transform_indices = @transform_0, window_bounds = array<i64: 1, 8, 4>}, {transform_indices = @transform_1, window_bounds = array<i64: 1, 8, 4>}, {transform_indices = @transform_2, window_bounds = array<i64: 1, 1, 2, 4>}, {pipeline_mode = #tpu.pipeline_mode<synchronous>, transform_indices = @transform_3, window_bounds = array<i64: 1, 4>}, {pipeline_mode = #tpu.pipeline_mode<synchronous>, transform_indices = @transform_4, window_bounds = array<i64: 1, 4>}, {pipeline_mode = #tpu.pipeline_mode<synchronous>, transform_indices = @transform_5, window_bounds = array<i64: 16, 8>}, {transform_indices = @transform_6, window_bounds = array<i64: 1, 8, 8>}]} {
    %c8_i32 = arith.constant 8 : i32
    %0 = arith.muli %arg1, %c8_i32 : i32
    %c0 = arith.constant 0 : index
    %c0_0 = arith.constant 0 : index
    %1 = vector.load %arg5[%c0, %c0_0] : memref<1x4xf32, #tpu.memory_space<vmem>>, vector<1x4xf32>
    %c0_1 = arith.constant 0 : index
    %c0_2 = arith.constant 0 : index
    %2 = vector.load %arg6[%c0_1, %c0_2] : memref<1x4xf32, #tpu.memory_space<vmem>>, vector<1x4xf32>
    %3 = tpu.iota {dimensions = array<i32: 0>} : vector<8x1xi32>
    %4 = vector.broadcast %0 : i32 to vector<8x1xi32>
    %5 = arith.addi %4, %3 : vector<8x1xi32>
    %c0_3 = arith.constant 0 : index
    %c0_4 = arith.constant 0 : index
    %c0_5 = arith.constant 0 : index
    %6 = vector.load %arg2[%c0_3, %c0_4, %c0_5] : memref<1x8x4xf32, #tpu.memory_space<vmem>>, vector<1x8x4xf32>
    %7 = vector.shape_cast %6 : vector<1x8x4xf32> to vector<8x4xf32>
    %cst = arith.constant dense<0.000000e+00> : vector<8xf32>
    %8 = vector.multi_reduction <add>, %7, %cst [1] : vector<8x4xf32> to vector<8xf32>
    %9 = vector.shape_cast %8 : vector<8xf32> to vector<8x1xf32>
    %cst_6 = arith.constant 4.000000e+00 : f32
    %10 = vector.broadcast %cst_6 : f32 to vector<8x1xf32>
    %11 = arith.divf %9, %10 : vector<8x1xf32>
    %12 = vector.broadcast %11 : vector<8x1xf32> to vector<8x4xf32>
    %13 = arith.subf %7, %12 : vector<8x4xf32>
    %14 = arith.mulf %13, %13 : vector<8x4xf32>
    %cst_7 = arith.constant dense<0.000000e+00> : vector<8xf32>
    %15 = vector.multi_reduction <add>, %14, %cst_7 [1] : vector<8x4xf32> to vector<8xf32>
    %16 = vector.shape_cast %15 : vector<8xf32> to vector<8x1xf32>
    %cst_8 = arith.constant 4.000000e+00 : f32
    %17 = vector.broadcast %cst_8 : f32 to vector<8x1xf32>
    %18 = arith.divf %16, %17 : vector<8x1xf32>
    %cst_9 = arith.constant 9.99999974E-6 : f32
    %19 = vector.broadcast %cst_9 : f32 to vector<8x1xf32>
    %20 = arith.addf %18, %19 : vector<8x1xf32>
    %21 = math.rsqrt %20 : vector<8x1xf32>
    %22 = vector.broadcast %21 : vector<8x1xf32> to vector<8x4xf32>
    %23 = arith.mulf %13, %22 : vector<8x4xf32>
    %24 = vector.broadcast %1 : vector<1x4xf32> to vector<8x4xf32>
    %25 = arith.mulf %23, %24 : vector<8x4xf32>
    %26 = vector.broadcast %2 : vector<1x4xf32> to vector<8x4xf32>
    %27 = arith.addf %25, %26 : vector<8x4xf32>
    %cst_10 = arith.constant 0.000000e+00 : f32
    %28 = vector.broadcast %cst_10 : f32 to vector<8x4xf32>
    %29 = arith.cmpf oge, %27, %28 : vector<8x4xf32>
    %cst_11 = arith.constant 0.00999999977 : f32
    %30 = vector.broadcast %cst_11 : f32 to vector<8x4xf32>
    %31 = arith.mulf %30, %27 : vector<8x4xf32>
    %32 = arith.select %29, %27, %31 : vector<8x4xi1>, vector<8x4xf32>
    %c0_12 = arith.constant 0 : index
    %c0_13 = arith.constant 0 : index
    %c0_14 = arith.constant 0 : index
    %33 = vector.load %arg3[%c0_12, %c0_13, %c0_14] : memref<1x8x4xf32, #tpu.memory_space<vmem>>, vector<1x8x4xf32>
    %34 = vector.shape_cast %33 : vector<1x8x4xf32> to vector<8x4xf32>
    %cst_15 = arith.constant dense<0.000000e+00> : vector<8xf32>
    %35 = vector.multi_reduction <add>, %34, %cst_15 [1] : vector<8x4xf32> to vector<8xf32>
    %36 = vector.shape_cast %35 : vector<8xf32> to vector<8x1xf32>
    %cst_16 = arith.constant 4.000000e+00 : f32
    %37 = vector.broadcast %cst_16 : f32 to vector<8x1xf32>
    %38 = arith.divf %36, %37 : vector<8x1xf32>
    %39 = vector.broadcast %38 : vector<8x1xf32> to vector<8x4xf32>
    %40 = arith.subf %34, %39 : vector<8x4xf32>
    %41 = arith.mulf %40, %40 : vector<8x4xf32>
    %cst_17 = arith.constant dense<0.000000e+00> : vector<8xf32>
    %42 = vector.multi_reduction <add>, %41, %cst_17 [1] : vector<8x4xf32> to vector<8xf32>
    %43 = vector.shape_cast %42 : vector<8xf32> to vector<8x1xf32>
    %cst_18 = arith.constant 4.000000e+00 : f32
    %44 = vector.broadcast %cst_18 : f32 to vector<8x1xf32>
    %45 = arith.divf %43, %44 : vector<8x1xf32>
    %cst_19 = arith.constant 9.99999974E-6 : f32
    %46 = vector.broadcast %cst_19 : f32 to vector<8x1xf32>
    %47 = arith.addf %45, %46 : vector<8x1xf32>
    %48 = math.rsqrt %47 : vector<8x1xf32>
    %49 = vector.broadcast %48 : vector<8x1xf32> to vector<8x4xf32>
    %50 = arith.mulf %40, %49 : vector<8x4xf32>
    %51 = vector.broadcast %1 : vector<1x4xf32> to vector<8x4xf32>
    %52 = arith.mulf %50, %51 : vector<8x4xf32>
    %53 = vector.broadcast %2 : vector<1x4xf32> to vector<8x4xf32>
    %54 = arith.addf %52, %53 : vector<8x4xf32>
    %cst_20 = arith.constant 0.000000e+00 : f32
    %55 = vector.broadcast %cst_20 : f32 to vector<8x4xf32>
    %56 = arith.cmpf oge, %54, %55 : vector<8x4xf32>
    %cst_21 = arith.constant 0.00999999977 : f32
    %57 = vector.broadcast %cst_21 : f32 to vector<8x4xf32>
    %58 = arith.mulf %57, %54 : vector<8x4xf32>
    %59 = arith.select %56, %54, %58 : vector<8x4xi1>, vector<8x4xf32>
    %c2_i32 = arith.constant 2 : i32
    %60 = vector.broadcast %c2_i32 : i32 to vector<8x1xi32>
    %61 = arith.muli %60, %5 : vector<8x1xi32>
    %c16_i32 = arith.constant 16 : i32
    %62 = vector.broadcast %c16_i32 : i32 to vector<8x1xi32>
    %63 = arith.cmpi slt, %61, %62 : vector<8x1xi32>
    %cst_22 = arith.constant 0.000000e+00 : f32
    %64 = vector.shape_cast %63 : vector<8x1xi1> to vector<8x1xi1>
    %65 = vector.broadcast %64 : vector<8x1xi1> to vector<8x4xi1>
    %66 = vector.broadcast %cst_22 : f32 to vector<8x4xf32>
    %67 = arith.select %65, %32, %66 : vector<8x4xi1>, vector<8x4xf32>
    %c2_i32_23 = arith.constant 2 : i32
    %68 = vector.broadcast %c2_i32_23 : i32 to vector<8x1xi32>
    %69 = arith.muli %68, %5 : vector<8x1xi32>
    %c1_i32 = arith.constant 1 : i32
    %70 = vector.broadcast %c1_i32 : i32 to vector<8x1xi32>
    %71 = arith.addi %69, %70 : vector<8x1xi32>
    %c16_i32_24 = arith.constant 16 : i32
    %72 = vector.broadcast %c16_i32_24 : i32 to vector<8x1xi32>
    %73 = arith.cmpi slt, %71, %72 : vector<8x1xi32>
    %cst_25 = arith.constant 0.000000e+00 : f32
    %74 = vector.shape_cast %73 : vector<8x1xi1> to vector<8x1xi1>
    %75 = vector.broadcast %74 : vector<8x1xi1> to vector<8x4xi1>
    %76 = vector.broadcast %cst_25 : f32 to vector<8x4xf32>
    %77 = arith.select %75, %59, %76 : vector<8x4xi1>, vector<8x4xf32>
    %c0_26 = arith.constant 0 : index
    %c0_27 = arith.constant 0 : index
    %c0_28 = arith.constant 0 : index
    %c0_29 = arith.constant 0 : index
    %78 = vector.load %arg4[%c0_26, %c0_27, %c0_28, %c0_29] : memref<1x1x2x4xf32, #tpu.memory_space<vmem>>, vector<1x1x2x4xf32>
    %79 = vector.shape_cast %78 : vector<1x1x2x4xf32> to vector<2x4xf32>
    %cst_30 = arith.constant dense<0.000000e+00> : vector<2xf32>
    %80 = vector.multi_reduction <add>, %79, %cst_30 [1] : vector<2x4xf32> to vector<2xf32>
    %81 = vector.shape_cast %80 : vector<2xf32> to vector<2x1xf32>
    %cst_31 = arith.constant 4.000000e+00 : f32
    %82 = vector.broadcast %cst_31 : f32 to vector<2x1xf32>
    %83 = arith.divf %81, %82 : vector<2x1xf32>
    %84 = vector.broadcast %83 : vector<2x1xf32> to vector<2x4xf32>
    %85 = arith.subf %79, %84 : vector<2x4xf32>
    %86 = arith.mulf %85, %85 : vector<2x4xf32>
    %cst_32 = arith.constant dense<0.000000e+00> : vector<2xf32>
    %87 = vector.multi_reduction <add>, %86, %cst_32 [1] : vector<2x4xf32> to vector<2xf32>
    %88 = vector.shape_cast %87 : vector<2xf32> to vector<2x1xf32>
    %cst_33 = arith.constant 4.000000e+00 : f32
    %89 = vector.broadcast %cst_33 : f32 to vector<2x1xf32>
    %90 = arith.divf %88, %89 : vector<2x1xf32>
    %cst_34 = arith.constant 9.99999974E-6 : f32
    %91 = vector.broadcast %cst_34 : f32 to vector<2x1xf32>
    %92 = arith.addf %90, %91 : vector<2x1xf32>
    %93 = math.rsqrt %92 : vector<2x1xf32>
    %94 = vector.broadcast %93 : vector<2x1xf32> to vector<2x4xf32>
    %95 = arith.mulf %85, %94 : vector<2x4xf32>
    %96 = vector.broadcast %1 : vector<1x4xf32> to vector<2x4xf32>
    %97 = arith.mulf %95, %96 : vector<2x4xf32>
    %98 = vector.broadcast %2 : vector<1x4xf32> to vector<2x4xf32>
    %99 = arith.addf %97, %98 : vector<2x4xf32>
    %cst_35 = arith.constant 0.000000e+00 : f32
    %100 = vector.broadcast %cst_35 : f32 to vector<2x4xf32>
    %101 = arith.cmpf oge, %99, %100 : vector<2x4xf32>
    %cst_36 = arith.constant 0.00999999977 : f32
    %102 = vector.broadcast %cst_36 : f32 to vector<2x4xf32>
    %103 = arith.mulf %102, %99 : vector<2x4xf32>
    %104 = arith.select %101, %99, %103 : vector<2x4xi1>, vector<2x4xf32>
    %c0_i32 = arith.constant 0 : i32
    %105 = arith.cmpi sgt, %0, %c0_i32 : i32
    %106 = arith.extui %105 : i1 to i32
    %107 = arith.sitofp %106 : i32 to f32
    %c8_i32_37 = arith.constant 8 : i32
    %108 = arith.addi %0, %c8_i32_37 : i32
    %c2_i32_38 = arith.constant 2 : i32
    %109 = arith.muli %c2_i32_38, %108 : i32
    %c16_i32_39 = arith.constant 16 : i32
    %110 = arith.cmpi slt, %109, %c16_i32_39 : i32
    %111 = arith.extui %110 : i1 to i32
    %112 = arith.sitofp %111 : i32 to f32
    %113 = vector.extract_strided_slice %104 {offsets = [0, 0], sizes = [1, 4], strides = [1, 1]} : vector<2x4xf32> to vector<1x4xf32>
    %114 = vector.broadcast %107 : f32 to vector<1x4xf32>
    %115 = arith.mulf %113, %114 : vector<1x4xf32>
    %116 = vector.extract_strided_slice %104 {offsets = [1, 0], sizes = [1, 4], strides = [1, 1]} : vector<2x4xf32> to vector<1x4xf32>
    %117 = vector.broadcast %112 : f32 to vector<1x4xf32>
    %118 = arith.mulf %116, %117 : vector<1x4xf32>
    %119 = tpu.iota {dimensions = array<i32: 0>} : vector<8x1xi32>
    %c1_i32_40 = arith.constant 1 : i32
    %120 = tpu.dynamic_rotate %77 by %c1_i32_40 dim 0 : vector<8x4xf32>, i32 -> vector<8x4xf32>
    %c0_i32_41 = arith.constant 0 : i32
    %121 = vector.broadcast %c0_i32_41 : i32 to vector<8x1xi32>
    %122 = arith.cmpi eq, %119, %121 : vector<8x1xi32>
    %123 = vector.shape_cast %122 : vector<8x1xi1> to vector<8x1xi1>
    %124 = vector.broadcast %123 : vector<8x1xi1> to vector<8x4xi1>
    %125 = vector.shape_cast %115 : vector<1x4xf32> to vector<1x4xf32>
    %126 = vector.broadcast %125 : vector<1x4xf32> to vector<8x4xf32>
    %127 = arith.select %124, %126, %120 : vector<8x4xi1>, vector<8x4xf32>
    %c7_i32 = arith.constant 7 : i32
    %128 = tpu.dynamic_rotate %67 by %c7_i32 dim 0 : vector<8x4xf32>, i32 -> vector<8x4xf32>
    %c7_i32_42 = arith.constant 7 : i32
    %129 = vector.broadcast %c7_i32_42 : i32 to vector<8x1xi32>
    %130 = arith.cmpi eq, %119, %129 : vector<8x1xi32>
    %131 = vector.shape_cast %130 : vector<8x1xi1> to vector<8x1xi1>
    %132 = vector.broadcast %131 : vector<8x1xi1> to vector<8x4xi1>
    %133 = vector.shape_cast %118 : vector<1x4xf32> to vector<1x4xf32>
    %134 = vector.broadcast %133 : vector<1x4xf32> to vector<8x4xf32>
    %135 = arith.select %132, %134, %128 : vector<8x4xi1>, vector<8x4xf32>
    %136 = tpu.concatenate %127, %67, %77, %135 in 1 : vector<8x4xf32>, vector<8x4xf32>, vector<8x4xf32>, vector<8x4xf32> -> vector<8x16xf32>
    %c0_43 = arith.constant 0 : index
    %c0_44 = arith.constant 0 : index
    %137 = vector.load %arg7[%c0_43, %c0_44] : memref<16x8xf32, #tpu.memory_space<vmem>>, vector<16x8xf32>
    %cst_45 = arith.constant dense<0.000000e+00> : vector<8x8xf32>
    %138 = tpu.matmul %136, %137, %cst_45 {dimension_numbers = #tpu.dot_dimension_numbers<[1], [0], [0], [1], [0, 0, 1, 1], [], []>} : vector<8x16xf32>, vector<16x8xf32>, vector<8x8xf32> -> vector<8x8xf32>
    %c0_46 = arith.constant 0 : index
    %c0_47 = arith.constant 0 : index
    %c0_48 = arith.constant 0 : index
    %139 = vector.load %arg8[%c0_46, %c0_47, %c0_48] : memref<1x8x8xf32, #tpu.memory_space<vmem>>, vector<1x8x8xf32>
    %140 = vector.shape_cast %139 : vector<1x8x8xf32> to vector<8x8xf32>
    %141 = vector.shape_cast %138 : vector<8x8xf32> to vector<1x8x8xf32>
    tpu.vector_store %arg8[%c0_46, %c0_47, %c0_48], %141 {strides = array<i32>} : memref<1x8x8xf32, #tpu.memory_space<vmem>>, vector<1x8x8xf32>,
    return
  }
  func.func @transform_0(%arg0: i32, %arg1: i32) -> (i32, i32, i32) {
    %c0_i32 = arith.constant 0 : i32
    %c0_i32_0 = arith.constant 0 : i32
    return %arg0, %arg1, %c0_i32 : i32, i32, i32
  }
  func.func @transform_1(%arg0: i32, %arg1: i32) -> (i32, i32, i32) {
    %c0_i32 = arith.constant 0 : i32
    %c0_i32_0 = arith.constant 0 : i32
    return %arg0, %arg1, %c0_i32 : i32, i32, i32
  }
  func.func @transform_2(%arg0: i32, %arg1: i32) -> (i32, i32, i32, i32) {
    %c0_i32 = arith.constant 0 : i32
    %c0_i32_0 = arith.constant 0 : i32
    %c0_i32_1 = arith.constant 0 : i32
    return %arg0, %arg1, %c0_i32, %c0_i32_0 : i32, i32, i32, i32
  }
  func.func @transform_3(%arg0: i32, %arg1: i32) -> (i32, i32) {
    %c0_i32 = arith.constant 0 : i32
    %c0_i32_0 = arith.constant 0 : i32
    %c0_i32_1 = arith.constant 0 : i32
    return %c0_i32, %c0_i32_0 : i32, i32
  }
  func.func @transform_4(%arg0: i32, %arg1: i32) -> (i32, i32) {
    %c0_i32 = arith.constant 0 : i32
    %c0_i32_0 = arith.constant 0 : i32
    %c0_i32_1 = arith.constant 0 : i32
    return %c0_i32, %c0_i32_0 : i32, i32
  }
  func.func @transform_5(%arg0: i32, %arg1: i32) -> (i32, i32) {
    %c0_i32 = arith.constant 0 : i32
    %c0_i32_0 = arith.constant 0 : i32
    %c0_i32_1 = arith.constant 0 : i32
    return %c0_i32, %c0_i32_0 : i32, i32
  }
  func.func @transform_6(%arg0: i32, %arg1: i32) -> (i32, i32, i32) {
    %c0_i32 = arith.constant 0 : i32
    %c0_i32_0 = arith.constant 0 : i32
    return %arg0, %arg1, %c0_i32 : i32, i32, i32
  }
}

</mosaic_0001>

<bundles_post_ra>
// kernel: tpu_custom_call.1
= control target key start
LH: loop header
LB: loop body
LE: loop exit
PB: predicated region body
PF: predicated region fallthrough
CT: control target
= control target key end

     0   :  { %s1615_s0 = inlined_call_operand.hbm [shape: f32[2,8,4], index: 0, kind: input, shape index: {}]   ;;  %s1616_s1 = inlined_call_operand.hbm [shape: f32[2,8,4], index: 1, kind: input, shape index: {}]   ;;  %s1617_s2 = inlined_call_operand.hbm [shape: f32[2,1,2,4], index: 2, kind: input, shape index: {}]   ;;  %s1618_s3 = inlined_call_operand.hbm [shape: f32[1,4], index: 3, kind: input, shape index: {}]   ;;  %s1619_s4 = inlined_call_operand.hbm [shape: f32[1,4], index: 4, kind: input, shape index: {}]   ;;  %s1620_s5 = inlined_call_operand.hbm [shape: f32[16,8], index: 5, kind: input, shape index: {}]   ;;  %s1621_s6 = inlined_call_operand.hbm [shape: f32[2,8,8], index: 6, kind: output, shape index: {}]  }
   0x1   :  { %1641 = sst [smem:[#allocation24_spill]] %s1616_s1 }
   0x2   :  { %1642 = sst [smem:[#allocation25_spill]] %s1618_s3 }
   0x3   :  { %1643 = sst [smem:[#allocation26_spill]] %s1619_s4 }
   0x4   :  { %11 = vsyncpa [#allocation3], 0 }
   0x5   :  { %13 = vsyncpa [#allocation3 + $0x1], 0 }
   0x6   :  { %14 = vsyncpa [#allocation6], 0 }
   0x7   :  { %16 = vsyncpa [#allocation6 + $0x1], 0 }
   0x8   :  { %17 = vsyncpa [#allocation9], 0 }
   0x9   :  { %18 = vsyncpa [#allocation12], 0 }
   0xa   :  { %19 = vsyncpa [#allocation4], 0 }
   0xb   :  { %21 = vsyncpa [#allocation4 + $0x1], 0  ;;  %s1261_s21 = smov 0   ;;  %s1263_s22 = smov 0  }
   0xc   :  { %s1265_s23 = smov 0   ;;  %s1267_s24 = smov 0  }
   0xd   :  { %s1269_s25 = smov 0   ;;  %s1271_s26 = smov 0  }
   0xe LB: > { %1644 = sst [smem:[#allocation19_spill]] %s1197_s23  ;;  %s1292_s27 = sadd.s32 4294967295, %s1209_s26   ;;  %s1209_s26 = sphi %s1271_s26, %s27_s26   ;;  %s1205_s25 = sphi %s1269_s25, %s1687_s25   ;;  %s1201_s24 = sphi %s1267_s24, %s1686_s24   ;;  %s1197_s23 = sphi %s1265_s23, %s1682_s23   ;;  %s1193_s22 = sphi %s1263_s22, %s1685_s22   ;;  %s1189_s21 = sphi %s1261_s21, %s1684_s21  }
   0xf   : > { %1645 = sst [smem:[#allocation20_spill]] %s1209_s26  ;;  %s784_s28 = sadd.s32 4294967294, %s1209_s26  }
  0x10   : > { %p61_p0 = scmp.ne.s32.totalorder %s1193_s22, %s1189_s21  ;;  %p1622_p1 = scmp.eq.s32.totalorder %s1292_s27, 0 }
  0x11   : > { %p212_p3 = scmp.eq.s32.totalorder %s784_s28, 1  ;;  %p785_p5 = scmp.ge.s32.totalorder %s1209_s26, 1 }
  0x12   : > { %p1301_p4 = por %p1622_p1, %p61_p0  ;;  %p219_p7 = scmp.lt.s32.totalorder %s1209_s26, 3 }
  0x13   : > { %p1306_p6 = por %p212_p3, %p61_p0  ;;  %s1211_s8 = smov [#allocation8]  }
  0x14   : > { %s1646_s29 = scalar_select %p1301_p4, 1, 0 }
  0x15   : > { %s1647_s30 = scalar_select %p1306_p6, 1, 0 }
  0x16   : > { %p1311_p8 = pnand %p785_p5, %p219_p7  ;;  %s232_s9 = sshll.u32 %s1211_s8, 4  ;;  %s233_s9 = int_to_ptr.vmem [resolvable:$true] %s232_s9 }
  0x17   : > { %1648 = sst [smem:[#allocation21_spill]] %s1647_s30  ;;  %s39_s11 = sadd.s32 1, %s1205_s25 }
  0x18   : > { %s1649_s7 = scalar_select %p1311_p8, 1, 0 }
  0x19   : > { %p844_p10 = pneg %p1311_p8  ;;  %s48_s12 = sadd.s32 1, %s1197_s23 }
  0x1a   : > { %p1326_p12 = scmp.ge.s32.totalorder %s39_s11, 2  ;;  %s1652_s3 = sld [smem:[#allocation25_spill]] }
  0x1b   : > { %p1320_p11 = pnand %p844_p10, %p1622_p1 }
  0x1c   : > { %s1651_s13 = scalar_select %p1326_p12, 1, 0 }
  0x1d   : > { %s1650_s10 = scalar_select %p1320_p11, 1, 0 }
  0x1e   : > { %p1338_p0 = pneg %p1320_p11 }
  0x20   : > { %s941_s16 = scalar_lea.hbm %s1652_s3, 16 }
  0x21   : > { %p942_p13 = scmp.ne.s32.totalorder %s1652_s3, %s941_s16  ;;  %p948_p7 = scmp.lt.u32.totalorder %s941_s16, %s1652_s3 }
  0x22   : > { %s1653_s19 = scalar_select %p1338_p0, 1, 0 }
  0x23   : > { %p944_p3 = pnand %p1338_p0, %p942_p13 }
  0x25   : > { %p945_p5 = pneg %p944_p3 }
  0x27   : > { %p950_p10 = pnand %p948_p7, %p945_p5 }
  0x29   : > { %953 = shalt.err (!%p950_p10)
}
  0x2a   : > { %s954_s8 = scalar_lea.vmem %s233_s9, 16  ;;  %s961_s14 = scalar_lea.vmem %s233_s9, 32 }
  0x2b   : > { %p955_p9 = scmp.ne.s32.totalorder %s233_s9, %s954_s8  ;;  %p962_p6 = scmp.lt.s32.totalorder %s233_s9, %s233_s9 }
  0x2c   : > { %p963_p4 = scmp.lt.s32.totalorder %s961_s14, %s954_s8 }
  0x2d   : > { %p957_p1 = pnand %p955_p9, %p1338_p0 }
  0x2e   : > { %p964_p8 = por %p963_p4, %p962_p6 }
  0x2f   : > { %p958_p2 = pneg %p957_p1 }
  0x31   : > { %p965_p12 = pnand %p964_p8, %p958_p2 }
  0x33   : > { %968 = shalt.err (!%p965_p12)
}
  0x34   : > { %847 = dma.hbm_to_vmem [thread:$0]  (!%p1320_p11), %s1652_s3, 16, %s233_s9, [#allocation9]  }
  0x35   : > { %p1654_p1 = scmp.ne.s32.totalorder %s1651_s13, 0  ;;  %p55_p2 = scmp.ne.s32.totalorder %s1197_s23, %s1193_s22 }
  0x36   : > { %p56_p4 = scmp.eq.s32.totalorder %s1209_s26, 0  ;;  %p871_p6 = scmp.lt.s32.totalorder %s1209_s26, 2 }
  0x37   : > { %s1689_s11 = smov (%p1654_p1, %s39_s11), 0  ;;  %p1656_p12 = scmp.eq.s32.totalorder %s1292_s27, 1 }
  0x38   : > { %1655 = sst [smem:[#allocation22_spill]] %s1689_s11  ;;  %s43_s16 = ssub.s32 %s1205_s25, %s1689_s11 }
  0x39   : > { %p46_p8 = scmp.eq.s32.totalorder %s43_s16, 0  ;;  %p57_p9 = por %p56_p4, %p55_p2 }
  0x3a   : > { %p1366_p13 = por %p1656_p12, %p55_p2  ;;  %s1371_s20 = sand.u32 1, %s1197_s23  }
  0x3b   : > { %s1376_s9 = scalar_select %p46_p8, %s1197_s23, %s48_s12  }
  0x3c   : > { %s1657_s18 = scalar_select %p1366_p13, 1, 0 }
  0x3d   : > { %1658 = sst [smem:[#allocation23_spill]] %s1376_s9  ;;  %s1629_s13 = sshll.u32 %s1371_s20, 3 }
  0x3e   : > { %s1630_s28 = sshll.u32 %s1205_s25, 7  ;;  %p1380_p3 = pnand %p871_p6, %p57_p9 }
  0x3f   : > { %s286_s14 = sand.u32 1, %s1209_s26   ;;  %s1660_s1 = sld [smem:[#allocation24_spill]] }
  0x40   : > { %s1659_s8 = scalar_select %p1380_p3, 1, 0 }
  0x41   : > { %s290_s12 = scalar_lea.vmem [#allocation5], %s1629_s13  ;;  %s1212_s11 = smov [#allocation10]  }
  0x42   : > { %s298_s3 = sshll.u32 %s290_s12, 4  ;;  %s1396_s9 = sshll.u32 %s1212_s11, 4  ;;  %s1394_s3 = int_to_ptr.vmem [resolvable:$true] %s298_s3  ;;  %s244_s9 = int_to_ptr.vmem [resolvable:$true] %s1396_s9 }
  0x43   : > { %s1398_s23 = scalar_lea.sflag [#allocation6], %s286_s14  ;;  %p1404_p7 = pneg %p1380_p3 }
  0x45   : > { %s1390_s16 = scalar_lea.hbm %s1660_s1, %s1630_s28  ;;  %s974_s13 = scalar_lea.hbm %s1660_s1, 256 }
  0x46   : > { %s969_s26 = scalar_lea.hbm %s1390_s16, 128  ;;  %p975_p2 = scmp.lt.u32.totalorder %s1390_s16, %s1660_s1 }
  0x47   : > { %p970_p5 = scmp.ne.s32.totalorder %s1390_s16, %s969_s26  ;;  %p976_p4 = scmp.lt.u32.totalorder %s974_s13, %s969_s26 }
  0x48   : > { %s1661_s15 = scalar_select %p1404_p7, 1, 0 }
  0x49   : > { %p972_p10 = pnand %p1404_p7, %p970_p5  ;;  %p977_p6 = por %p976_p4, %p975_p2 }
  0x4a   : > { %p978_p8 = scmp.lt.u32.totalorder %s969_s26, %s1390_s16 }
  0x4b   : > { %p973_p1 = pneg %p972_p10 }
  0x4c   : > { %p979_p9 = por %p978_p8, %p977_p6 }
  0x4e   : > { %p980_p12 = pnand %p979_p9, %p973_p1 }
  0x50   : > { %983 = shalt.err (!%p980_p12)
}
  0x51   : > { %s984_s14 = scalar_lea.vmem %s1394_s3, 128  ;;  %s1213_s17 = smov [#allocation5]  }
  0x52   : > { %p985_p5 = scmp.ne.s32.totalorder %s1394_s3, %s984_s14  ;;  %s989_s12 = sshll.u32 %s1213_s17, 4  ;;  %s990_s12 = int_to_ptr.vmem [resolvable:$false] %s989_s12 }
  0x53   : > { %s991_s28 = scalar_lea.vmem %s990_s12, 256  ;;  %p992_p11 = scmp.lt.s32.totalorder %s1394_s3, %s990_s12 }
  0x54   : > { %p987_p10 = pnand %p985_p5, %p1404_p7  ;;  %p993_p0 = scmp.lt.s32.totalorder %s991_s28, %s984_s14 }
  0x56   : > { %p988_p13 = pneg %p987_p10  ;;  %p994_p2 = por %p993_p0, %p992_p11 }
  0x58   : > { %p995_p4 = pnand %p994_p2, %p988_p13 }
  0x5a   : > { %998 = shalt.err (!%p995_p4)
}
  0x5b   : > { %860 = dma.hbm_to_vmem [thread:$0]  (!%p1380_p3), %s1390_s16, 128, %s1394_s3, %s1398_s23  }
  0x5c   : > { %s1662_s4 = sld [smem:[#allocation26_spill]]  ;;  %p1663_p11 = scmp.ne.s32.totalorder %s1653_s19, 0 }
  0x62   : > { %s999_s11 = scalar_lea.hbm %s1662_s4, 16 }
  0x63   : > { %p1000_p1 = scmp.ne.s32.totalorder %s1662_s4, %s999_s11  ;;  %p1006_p6 = scmp.lt.u32.totalorder %s999_s11, %s1662_s4 }
  0x65   : > { %p1002_p0 = pnand %p1000_p1, %p1663_p11 }
  0x67   : > { %p1003_p13 = pneg %p1002_p0 }
  0x69   : > { %p1008_p8 = pnand %p1006_p6, %p1003_p13 }
  0x6b   : > { %1011 = shalt.err (!%p1008_p8)
}
  0x6c   : > { %s1012_s28 = scalar_lea.vmem %s244_s9, 16  ;;  %s1019_s3 = scalar_lea.vmem %s244_s9, 32 }
  0x6d   : > { %p1013_p9 = scmp.ne.s32.totalorder %s244_s9, %s1012_s28  ;;  %p1020_p10 = scmp.lt.s32.totalorder %s244_s9, %s244_s9 }
  0x6e   : > { %p1021_p2 = scmp.lt.s32.totalorder %s1019_s3, %s1012_s28 }
  0x6f   : > { %p1015_p12 = pnand %p1013_p9, %p1663_p11 }
  0x70   : > { %p1022_p4 = por %p1021_p2, %p1020_p10 }
  0x71   : > { %p1016_p5 = pneg %p1015_p12 }
  0x73   : > { %p1023_p3 = pnand %p1022_p4, %p1016_p5 }
  0x75   : > { %1026 = shalt.err (!%p1023_p3)
}
  0x76   : > { %p1664_p1 = scmp.ne.s32.totalorder %s1650_s10, 0  ;;  %s1214_s26 = smov [#allocation11]  }
  0x77   : > { %s253_s13 = sshll.u32 %s1214_s26, 4  ;;  %s1027_s14 = scalar_lea.hbm %s1620_s5, 256  ;;  %s254_s13 = int_to_ptr.vmem [resolvable:$true] %s253_s13 }
  0x78   : > { %850 = dma.hbm_to_vmem [thread:$0]  (!%p1664_p1), %s1662_s4, 16, %s244_s9, [#allocation9]  }
  0x79   : > { %p1028_p0 = scmp.ne.s32.totalorder %s1620_s5, %s1027_s14  ;;  %p1034_p6 = scmp.lt.u32.totalorder %s1027_s14, %s1620_s5 }
  0x7b   : > { %p1030_p3 = pnand %p1028_p0, %p1663_p11 }
  0x7d   : > { %p1031_p13 = pneg %p1030_p3 }
  0x7f   : > { %p1036_p8 = pnand %p1034_p6, %p1031_p13 }
  0x81   : > { %1039 = shalt.err (!%p1036_p8)
}
  0x82   : > { %s1040_s9 = scalar_lea.vmem %s254_s13, 256  ;;  %p1048_p10 = scmp.lt.s32.totalorder %s254_s13, %s254_s13 }
  0x83   : > { %p1041_p9 = scmp.ne.s32.totalorder %s254_s13, %s1040_s9  ;;  %p1049_p2 = scmp.lt.s32.totalorder %s1040_s9, %s1040_s9 }
  0x85   : > { %p1043_p12 = pnand %p1041_p9, %p1663_p11  ;;  %p1050_p4 = por %p1049_p2, %p1048_p10 }
  0x87   : > { %p1044_p5 = pneg %p1043_p12 }
  0x89   : > { %p1051_p7 = pnand %p1050_p4, %p1044_p5 }
  0x8b   : > { %1054 = shalt.err (!%p1051_p7)
}
  0x8c   : > { %s1215_s30 = smov 128   ;;  %s1216_s1 = smov 8  }
  0x8d   : > { %853 = dma.hbm_to_vmem [thread:$0]  (!%p1664_p1), %s1620_s5, 256, %s254_s13, [#allocation12], %s1215_s30, %s1215_s30, %s1216_s1  }
  0x8e   : > { %s1665_s19 = sshll.u32 %s1205_s25, 7  ;;  %s1666_s12 = sshll.u32 %s1371_s20, 3 }
  0x8f   : > { %s1470_s14 = scalar_lea.hbm %s1615_s0, %s1665_s19  ;;  %s271_s28 = scalar_lea.vmem [#allocation2], %s1666_s12 }
  0x90   : > { %s279_s3 = sshll.u32 %s271_s28, 4  ;;  %s794_s10 = sshll.u32 %s1371_s20, 1  ;;  %s1474_s3 = int_to_ptr.vmem [resolvable:$true] %s279_s3 }
  0x91   : > { %s268_s9 = scalar_lea.sflag [#allocation3], %s1371_s20  ;;  %s1055_s4 = scalar_lea.hbm %s1470_s14, 128 }
  0x92   : > { %p1056_p7 = scmp.ne.s32.totalorder %s1470_s14, %s1055_s4  ;;  %p1667_p11 = scmp.ne.s32.totalorder %s1661_s15, 0 }
  0x93   : > { %s1060_s1 = scalar_lea.hbm %s1615_s0, 256  ;;  %p1061_p3 = scmp.lt.u32.totalorder %s1470_s14, %s1615_s0 }
  0x94   : > { %p1058_p1 = pnand %p1056_p7, %p1667_p11  ;;  %p1062_p13 = scmp.lt.u32.totalorder %s1060_s1, %s1055_s4 }
  0x95   : > { %p1064_p8 = scmp.lt.u32.totalorder %s1055_s4, %s1470_s14 }
  0x96   : > { %p1059_p0 = pneg %p1058_p1  ;;  %p1063_p6 = por %p1062_p13, %p1061_p3 }
  0x98   : > { %p1065_p9 = por %p1064_p8, %p1063_p6 }
  0x9a   : > { %p1066_p12 = pnand %p1065_p9, %p1059_p0 }
  0x9c   : > { %1069 = shalt.err (!%p1066_p12)
}
  0x9d   : > { %s1070_s19 = scalar_lea.vmem %s1474_s3, 128  ;;  %s1217_s11 = smov [#allocation2]  }
  0x9e   : > { %p1071_p5 = scmp.ne.s32.totalorder %s1474_s3, %s1070_s19  ;;  %s1075_s17 = sshll.u32 %s1217_s11, 4  ;;  %s1076_s17 = int_to_ptr.vmem [resolvable:$false] %s1075_s17 }
  0x9f   : > { %s1077_s12 = scalar_lea.vmem %s1076_s17, 256  ;;  %p1078_p4 = scmp.lt.s32.totalorder %s1474_s3, %s1076_s17 }
  0xa0   : > { %p1073_p10 = pnand %p1071_p5, %p1667_p11  ;;  %p1079_p7 = scmp.lt.s32.totalorder %s1077_s12, %s1070_s19 }
  0xa2   : > { %p1074_p2 = pneg %p1073_p10  ;;  %p1080_p1 = por %p1079_p7, %p1078_p4 }
  0xa4   : > { %p1081_p3 = pnand %p1080_p1, %p1074_p2 }
  0xa6   : > { %1084 = shalt.err (!%p1081_p3)
}
  0xa7   : > { %p1668_p0 = scmp.ne.s32.totalorder %s1659_s8, 0  ;;  %s795_s4 = sshll.u32 %s1205_s25, 5 }
  0xa8   : > { %s1503_s30 = scalar_lea.hbm %s1617_s2, %s795_s4  ;;  %s309_s1 = scalar_lea.vmem [#allocation7], %s794_s10 }
  0xa9   : > { %857 = dma.hbm_to_vmem [thread:$0]  (!%p1668_p0), %s1470_s14, 128, %s1474_s3, %s268_s9  }
  0xaa   : > { %s317_s16 = sshll.u32 %s309_s1, 4  ;;  %s1085_s26 = scalar_lea.hbm %s1503_s30, 32  ;;  %s318_s16 = int_to_ptr.vmem [resolvable:$true] %s317_s16 }
  0xab   : > { %p1086_p13 = scmp.ne.s32.totalorder %s1503_s30, %s1085_s26  ;;  %s1090_s9 = scalar_lea.hbm %s1617_s2, 64 }
  0xac   : > { %p1091_p9 = scmp.lt.u32.totalorder %s1503_s30, %s1617_s2  ;;  %p1092_p12 = scmp.lt.u32.totalorder %s1090_s9, %s1085_s26 }
  0xad   : > { %p1088_p6 = pnand %p1086_p13, %p1667_p11  ;;  %p1094_p10 = scmp.lt.u32.totalorder %s1085_s26, %s1503_s30 }
  0xae   : > { %p1093_p5 = por %p1092_p12, %p1091_p9 }
  0xaf   : > { %p1089_p8 = pneg %p1088_p6 }
  0xb0   : > { %p1095_p2 = por %p1094_p10, %p1093_p5 }
  0xb2   : > { %p1096_p4 = pnand %p1095_p2, %p1089_p8 }
  0xb4   : > { %1099 = shalt.err (!%p1096_p4)
}
  0xb5   : > { %s1100_s20 = scalar_lea.vmem %s318_s16, 32  ;;  %s1218_s10 = smov [#allocation7]  }
  0xb6   : > { %p1101_p7 = scmp.ne.s32.totalorder %s318_s16, %s1100_s20  ;;  %s1105_s17 = sshll.u32 %s1218_s10, 4  ;;  %s1106_s17 = int_to_ptr.vmem [resolvable:$false] %s1105_s17 }
  0xb7   : > { %s1107_s12 = scalar_lea.vmem %s1106_s17, 64  ;;  %p1108_p13 = scmp.lt.s32.totalorder %s318_s16, %s1106_s17 }
  0xb8   : > { %p1103_p1 = pnand %p1101_p7, %p1667_p11  ;;  %p1109_p6 = scmp.lt.s32.totalorder %s1107_s12, %s1100_s20 }
  0xba   : > { %p1104_p3 = pneg %p1103_p1  ;;  %p1110_p0 = por %p1109_p6, %p1108_p13 }
  0xbc   : > { %p1111_p9 = pnand %p1110_p0, %p1104_p3 }
  0xbe   : > { %1114 = shalt.err (!%p1111_p9)
}
  0xbf   : > { %p1669_p12 = scmp.ne.s32.totalorder %s1659_s8, 0  ;;  %p1670_p8 = scmp.ne.s32.totalorder %s1649_s7, 0 }
  0xc0   : > { %s1528_s15 = sand.u32 (!%p1670_p8), 1, %s1193_s22   ;;  %p1671_p11 = scmp.ne.s32.totalorder (!%p1670_p8), %s1646_s29, 0 }
  0xc1   : > { %863 = dma.hbm_to_vmem [thread:$0]  (!%p1669_p12), %s1503_s30, 32, %s318_s16, %s1398_s23  }
  0xc2   : > { %326 = sbr.rel (%p1670_p8) target bundleno = 879 (0x36f), region = 44  ;;  %s1531_s4 = sshll.u32 (!%p1670_p8), %s1528_s15, 3 }
  0xc3   : > { %s329_s28 = scalar_lea.sflag (!%p1670_p8), [#allocation3], %s1528_s15  ;;  %s332_s13 = scalar_lea.vmem (!%p1670_p8), [#allocation2], %s1531_s4 }
  0xc9   : > { %1168 = dma.done.wait (%p1671_p11), %s329_s28, 128  }
  0xca   : > { %1170 = vsyncadd (%p1671_p11), %s329_s28, 4294967168  ;;  %s337_s23 = sand.u32 1, %s1292_s27   ;;  %s341_s8 = scalar_lea.vmem [#allocation5], %s1531_s4 }
  0xcb   : > { %s338_s7 = scalar_lea.sflag [#allocation6], %s337_s23 }
  0xcc   : > { %1172 = dma.done.wait (%p1671_p11), %s338_s7, 160  }
  0xcd   : > { %1174 = vsyncadd (%p1671_p11), %s338_s7, 4294967136  ;;  %s799_s30 = sshll.u32 %s1528_s15, 1  ;;  %p1672_p0 = scmp.eq.s32.totalorder %s1292_s27, 0 }
  0xce   : > { %s350_s1 = scalar_lea.vmem [#allocation7], %s799_s30 }
  0xcf   : > { %1176 = dma.done.wait (%p1672_p0), [#allocation9], 32   ;;  %p1673_p5 = pmov %p1672_p0 }
  0xd0   : > { %p1674_p10 = pmov %p1672_p0 }
  0xd1   : > { %1178 = vsyncadd (%p1673_p5), [#allocation9], 4294967264 }
  0xd2   : > { %1180 = dma.done.wait (%p1674_p10), [#allocation12], 256   ;;  %p1675_p2 = pmov %p1672_p0 }
  0xd3   : > { %vm471_vm0 = vcmask 25600   ;;  %vm409_vm1 = vcmask 31744   ;;  %v470_v0 = vld [vmem:[%s350_s1] sm:$0x3]  ;;  %v441_v1 = vld [vmem:[%s341_s8] sm:$0xff]  ;;  %v404_v30 = vlaneseq  ;;  %v537_v36 = vld [vmem:[#allocation11] sm:$0xff] }
  0xd4   : > { %1182 = vsyncadd (%p1675_p2), [#allocation12], 4294967040  ;;  %v408_v2 = vld [vmem:[%s332_s13] sm:$0xff]  ;;  %v472_v3 = vsel %vm471_vm0, %v470_v0, 0.0  ;;  %v442_v4 = vsel %vm409_vm1, %v441_v1, 0.0  ;;  %v538_v37 = vld [vmem:[#allocation11 + $0x8] sm:$0xff] }
  0xd5   : > { %473 = vadd.xlane.f32.xlu0 %v472_v3  ;;  %443 = vadd.xlane.f32.xlu1 %v442_v4  ;;  %v410_v5 = vsel %vm409_vm1, %v408_v2, 0.0  ;;  %v405_v31 = vshrl.u32 %v404_v30, 7  ;;  %v804_v33 = vld [vmem:[#allocation8] ss:$0 sm:$0xff]  ;;  %v805_v35 = vld [vmem:[#allocation10] ss:$0 sm:$0xff]  ;;  %v822_v40 = vpack.c.bf16 %v538_v37, %v537_v36 }
  0xd6   : > { %v1219_v42 = vmov 0.0|0.0   ;;  %vm1220_vm3 = vmmov 0   ;;  %v1221_v50 = vmov 0.0   ;;  %s1222_s27 = smov 8   ;;  %s1223_s29 = smov 4   ;;  %vm533_vm10 = vcmask 64512  }
  0xd7   : > { %v460_v38 = vmul.u32 2, %v405_v31  ;;  %821 = vmatprep.subr.bf16.mxu0 %v1219_v42  ;;  %818 = vmatprep.mubr.msk.f32.mxu0 %vm1220_vm3, %v1221_v50  ;;  %v508_v52 = vsub.s32 0, %v405_v31  ;;  %v517_v58 = vsub.s32 1, %v405_v31  ;;  %vm503_vm8 = vcmp.eq.s32.totalorder %v405_v31, 0  ;;  %s1224_s16 = smov 12   ;;  %s808_s26 = sshll.u32 %s1201_s24, 7 }
  0xd8   : > { %823 = vmatpush3.bf16.msra.mxu0 %v822_v40  ;;  %vm512_vm9 = vcmp.eq.s32.totalorder %v405_v31, 7  ;;  %vm535_vm11 = vcmask 97280   ;;  %vm539_vm12 = vcmask 130048   ;;  %s400_s14 = scalar_lea.vmem [#allocation13], %s1531_s4  ;;  %s1566_s11 = scalar_lea.hbm %s1621_s6, %s808_s26 }
  0xd9   : > { %411 = vadd.xlane.f32.xlu0 %v410_v5  ;;  %v465_v48 = vadd.s32 1, %v460_v38  ;;  %vm461_vm7 = vcmp.lt.s32.totalorder %v460_v38, 16  ;;  %s629_s3 = sshll.u32 %s400_s14, 4  ;;  %s615_s20 = scalar_lea.sflag [#allocation4], %s1528_s15  ;;  %s1568_s3 = int_to_ptr.vmem [resolvable:$true] %s629_s3 }
  0xda   : > { %s1115_s10 = scalar_lea.vmem %s1568_s3, 128  ;;  %p1676_p7 = scmp.ne.s32.totalorder %s1657_s18, 0 }
  0xdb   : > { %vm466_vm5 = vcmp.lt.s32.totalorder %v465_v48, 16  ;;  %p1116_p4 = scmp.ne.s32.totalorder %s1568_s3, %s1115_s10  ;;  %s1225_s24 = smov [#allocation13]  }
  0xdc   : > { %s1119_s17 = sshll.u32 %s1225_s24, 4  ;;  %s1120_s17 = int_to_ptr.vmem [resolvable:$false] %s1119_s17 }
  0xdd   : > { %p1117_p1 = pnand %p1116_p4, %p1676_p7  ;;  %s1121_s12 = scalar_lea.vmem %s1120_s17, 256 }
  0xde   : > { %p1122_p13 = scmp.lt.s32.totalorder %s1568_s3, %s1120_s17  ;;  %p1123_p6 = scmp.lt.s32.totalorder %s1121_s12, %s1115_s10 }
  0xdf   : > { %p1118_p3 = pneg %p1117_p1 }
  0xe0   : > { %p1124_p9 = por %p1123_p6, %p1122_p13 }
  0xe2   : > { %p1125_p12 = pnand %p1124_p9, %p1118_p3 }
 0x162   : > { %v474_v6 = vpop.xlane.xlu0 %473  ;;  %v444_v7 = vpop.xlane.xlu1 %443 }
 0x163   : > { %v475_v8 = vmul.f32 0.25, %v474_v6  ;;  %v445_v9 = vmul.f32 0.25, %v444_v7 }
 0x165   : > { %v476_v10 = vsub.f32 %v470_v0, %v475_v8  ;;  %v446_v11 = vsub.f32 %v441_v1, %v445_v9 }
 0x166   : > { %v412_v12 = vpop.xlane.xlu0 %411 }
 0x167   : > { %v414_v13 = vmul.f32 0.25, %v412_v12  ;;  %v477_v14 = vmul.f32 %v476_v10, %v476_v10  ;;  %v447_v15 = vmul.f32 %v446_v11, %v446_v11 }
 0x169   : > { %v415_v16 = vsub.f32 %v408_v2, %v414_v13  ;;  %v478_v17 = vsel %vm471_vm0, %v477_v14, 0.0  ;;  %v448_v18 = vsel %vm409_vm1, %v447_v15, 0.0 }
 0x16a   : > { %479 = vadd.xlane.f32.xlu1 %v478_v17 }
 0x16b   : > { %v416_v19 = vmul.f32 %v415_v16, %v415_v16 }
 0x16d   : > { %v417_v20 = vsel %vm409_vm1, %v416_v19, 0.0 }
 0x16e   : > { %449 = vadd.xlane.f32.xlu1 %v448_v18  ;;  %418 = vadd.xlane.f32.xlu0 %v417_v20 }
 0x1f7   : > { %v480_v21 = vpop.xlane.xlu1 %479 }
 0x1f8   : > { %v481_v22 = vmul.f32 0.25, %v480_v21 }
 0x1fa   : > { %v482_v23 = vadd.f32 1e-05, %v481_v22 }
 0x1fb   : > { %v450_v24 = vpop.xlane.xlu1 %449  ;;  %v419_v25 = vpop.xlane.xlu0 %418 }
 0x1fc   : > { %935 = vrsqrt.f32 %v482_v23  ;;  %v451_v26 = vmul.f32 0.25, %v450_v24  ;;  %v420_v27 = vmul.f32 0.25, %v419_v25 }
 0x1fe   : > { %v452_v28 = vadd.f32 1e-05, %v451_v26  ;;  %v421_v29 = vadd.f32 1e-05, %v420_v27 }
 0x200   : > { %937 = vrsqrt.f32 %v452_v28 }
 0x201   : > { %939 = vrsqrt.f32 %v421_v29 }
 0x206   : > { %v936_v32 = vpop.eup %935 }
 0x207   : > { %v484_v34 = vmul.f32 %v936_v32, %v476_v10 }
 0x209   : > { %v485_v39 = vmul.f32 %v804_v33, %v484_v34 }
 0x20a   : > { %v938_v41 = vpop.eup %937 }
 0x20b   : > { %v940_v43 = vpop.eup %939  ;;  %v454_v44 = vmul.f32 %v938_v41, %v446_v11  ;;  %v486_v45 = vadd.f32 %v805_v35, %v485_v39 }
 0x20c   : > { %v423_v46 = vmul.f32 %v940_v43, %v415_v16 }
 0x20d   : > { %v455_v47 = vmul.f32 %v804_v33, %v454_v44  ;;  %vm487_vm2 = vcmp.ge.f32.partialorder %v486_v45, 0.0  ;;  %v488_v49 = vmul.f32 0.01, %v486_v45 }
 0x20e   : > { %v430_v51 = vmul.f32 %v804_v33, %v423_v46 }
 0x20f   : > { %v456_v53 = vadd.f32 %v805_v35, %v455_v47  ;;  %v489_v54 = vsel %vm487_vm2, %v486_v45, %v488_v49 }
 0x210   : > { %v437_v55 = vadd.f32 %v805_v35, %v430_v51  ;;  %v499_v56 = vmul.f32 0.0, %v489_v54 }
 0x211   : > { %vm457_vm4 = vcmp.ge.f32.partialorder %v456_v53, 0.0  ;;  %v458_v57 = vmul.f32 0.01, %v456_v53 }
 0x212   : > { %vm438_vm6 = vcmp.ge.f32.partialorder %v437_v55, 0.0  ;;  %v439_v59 = vmul.f32 0.01, %v437_v55  ;;  %v509_v60 = vrot.slane %v499_v56, %v508_v52  ;;  %v518_v3 = vrot.slane %v499_v56, %v517_v58 }
 0x213   : > { %v459_v61 = vsel %vm457_vm4, %v456_v53, %v458_v57 }
 0x214   : > { %v469_v62 = vsel %vm466_vm5, %v459_v61, 0.0  ;;  %v440_v63 = vsel %vm438_vm6, %v437_v55, %v439_v59 }
 0x215   : > { %525 = vrot.lane.b32.xlu1 %v469_v62, %s1222_s27  ;;  %v502_v0 = vrot.slane %v469_v62, 7  ;;  %v464_v1 = vsel %vm461_vm7, %v440_v63, 0.0 }
 0x216   : > { %521 = vrot.lane.b32.xlu0 %v464_v1, %s1223_s29  ;;  %v511_v2 = vrot.slane %v464_v1, 1 }
 0x217   : > { %v510_v4 = vsel %vm503_vm8, %v509_v60, %v502_v0 }
 0x218   : > { %v519_v5 = vsel %vm512_vm9, %v518_v3, %v511_v2 }
 0x219   : > { %529 = vrot.lane.b32.xlu1 %v519_v5, %s1224_s16 }
 0x287   : > { %v526_v6 = vpop.permute.xlu1 %525 }
 0x288   : > { %v522_v7 = vpop.permute.xlu0 %521 }
 0x289   : > { %v532_v8 = vsel %vm409_vm1, %v510_v4, %v522_v7 }
 0x28a   : > { %v534_v9 = vsel %vm533_vm10, %v532_v8, %v526_v6 }
 0x28b   : > { %v530_v10 = vpop.permute.xlu1 %529 }
 0x28c   : > { %v536_v11 = vsel %vm535_vm11, %v534_v9, %v530_v10 }
 0x28d   : > { %819 = vmatmul.mubr.msk.f32.vlgmr.msra.gmra.mrb[0].mxu0 %vm539_vm12, %v536_v11 }
 0x360   : > { %v609_v12 = vpop.f32.mrb[0].mxu0 }
 0x361   : > { %613 = vst.msk [vmem:[%s400_s14] sm:$0xff] %vm533_vm10, %v609_v12  ;;  %v820_v13 = vpop.f32.mrb[1].mxu0 }
 0x362   : > { %1128 = shalt.err (!%p1125_p12)
}
 0x363   : > { %s1129_s15 = scalar_lea.hbm %s1566_s11, 128  ;;  %s1133_s13 = scalar_lea.hbm %s1621_s6, 256 }
 0x364   : > { %p1130_p8 = scmp.ne.s32.totalorder %s1566_s11, %s1129_s15  ;;  %p1134_p5 = scmp.lt.u32.totalorder %s1566_s11, %s1621_s6 }
 0x365   : > { %p1135_p10 = scmp.lt.u32.totalorder %s1133_s13, %s1129_s15  ;;  %p1137_p4 = scmp.lt.u32.totalorder %s1129_s15, %s1566_s11 }
 0x366   : > { %p1131_p11 = pnand %p1130_p8, %p1676_p7 }
 0x367   : > { %p1136_p2 = por %p1135_p10, %p1134_p5 }
 0x368   : > { %p1132_p0 = pneg %p1131_p11 }
 0x369   : > { %p1138_p1 = por %p1137_p4, %p1136_p2 }
 0x36b   : > { %p1139_p3 = pnand %p1138_p1, %p1132_p0 }
 0x36d   : > { %1142 = shalt.err (!%p1139_p3)
}
 0x36e   : > { %842 = dma.vmem_to_hbm [thread:$0]  (%p1676_p7), %s1568_s3, 128, %s1566_s11, %s615_s20  }
 0x36f PF: > { %s1677_s8 = sld [smem:[#allocation21_spill]]  ;;  %s1678_s30 = sld [smem:[#allocation20_spill]] }
 0x370   : > { %s641_s1 = sand.u32 1, %s1189_s21  }
 0x371   : > { %s642_s27 = scalar_lea.sflag [#allocation4], %s641_s1 }
 0x375   : > { %p1679_p13 = scmp.ne.s32.totalorder %s1677_s8, 0  ;;  %p1680_p6 = scmp.ge.s32.totalorder %s1678_s30, 2 }
 0x377   : > { %p865_p9 = pnand %p1680_p6, %p1679_p13 }
 0x379   : > { %1184 = dma.done.wait (!%p865_p9), %s642_s27, 128  }
 0x37a   : > { %1186 = vsyncadd (!%p865_p9), %s642_s27, 4294967168  ;;  %s27_s26 = sadd.s32 1, %s1678_s30   ;;  %s1681_s29 = sld [smem:[#allocation19_spill]] }
 0x37b   : > { %p24_p12 = scmp.ge.s32.totalorder %s27_s26, 4   ;;  %s1682_s23 = sld [smem:[#allocation23_spill]] }
 0x37c   : > { %s1683_s18 = sld [smem:[#allocation22_spill]]  ;;  %s1684_s21 = smov %s1193_s22 }
 0x37d   : > { %s1686_s24 = smov %s1205_s25  ;;  %26 = sbr.rel (!%p24_p12) target bundleno = 14 (0xe), region = 125 }
 0x380   : > { %s1685_s22 = smov %s1681_s29 }
 0x382   : > { %s1687_s25 = smov %s1683_s18 }
 0x384   :  { %647 = vsyncpa [#allocation3], 1 }
 0x385   :  { %649 = vsyncpa [#allocation3 + $0x1], 1 }
 0x386   :  { %650 = vsyncpa [#allocation6], 1 }
 0x387   :  { %652 = vsyncpa [#allocation6 + $0x1], 1 }
 0x388   :  { %653 = vsyncpa [#allocation9], 1 }
 0x389   :  { %654 = vsyncpa [#allocation12], 1 }
 0x38a   :  { %655 = vsyncpa [#allocation4], 1 }
 0x38b   :  { %657 = vsyncpa [#allocation4 + $0x1], 1 }

</bundles_post_ra>
